<compile_context>
chip_gen: v7x
topology: tpu7x:2x2x1
jax: 0.10.0
libtpu: 0.0.40
codegen_flags: <defaults>
</compile_context>

<pallas_src>
import jax
import jax.numpy as jnp
import numpy as np
from jax.experimental import pallas as pl
from jax.experimental.pallas import tpu as pltpu


def make_dygcn_kernel(cheby_k: int, kd_pad: int,
                      matmul_dtype=jnp.float32, approx_recip: bool = False):
    assert cheby_k >= 2, "DyGCN Chebyshev recursion requires cheby_k >= 2"

    def kernel(xt_ref, emb_ref, st_ref, wt_ref, bt_ref, o_ref):
        # xt_ref : (BB, Din, N)          x transposed (node axis on lanes)
        # emb_ref: (BB, N, E)            all_emb (used only for supports)
        # st_ref : (BB, E, N)            station_emb transposed
        # wt_ref : (Dout, E*KDpad)       conv weights, (e, k, i)-major rows, transposed
        # bt_ref : (Dout, E)             bias_pool transposed
        # o_ref  : (BB, Dout, N)         output transposed (node axis on lanes)
        emb = emb_ref[...].astype(jnp.float32)
        bb, n, _ = emb.shape

        # supports = softmax(relu(emb @ emb^T), axis=-1), batched over BB (kept in f32).
        logits = jax.lax.dot_general(
            emb, emb, (((2,), (2,)), ((0,), (0,))),
            preferred_element_type=jnp.float32)                  # (BB, N, N)
        logits = jnp.maximum(logits, 0.0)
        m = jnp.max(logits, axis=-1, keepdims=True)
        ex = jnp.exp(logits - m)
        denom = jnp.sum(ex, axis=-1, keepdims=True)
        supports = ex * pl.reciprocal(denom, approx=approx_recip)
        supports = supports.astype(matmul_dtype)                 # cast once for the dots

        def bmm_t(a):
            # a: (BB, D', N).  result[b,d,i] = sum_j a[b,d,j] * S[b,i,j]  ==  (S @ a^T)^T
            # (last-dim/last-dim contraction -> node-lane-dense MXU output, no S^T copy)
            return jax.lax.dot_general(
                a.astype(matmul_dtype), supports,
                (((2,), (2,)), ((0,), (0,))),
                preferred_element_type=jnp.float32)

        xt = xt_ref[...].astype(jnp.float32)                     # (BB, Din, N)
        din = xt.shape[1]

        # Chebyshev recursion directly on x_g (T_0 = I handled for free), transposed:
        #   xg^T_0 = x^T, xg^T_1 = (S x)^T, xg^T_k = (2*xg^T_{k-1}) S^T - xg^T_{k-2}
        # Factor 2 folded into the small (Din, N) operand; no 2*supports buffer.
        xg = [xt, bmm_t(xt)]
        for _ in range(2, cheby_k):
            xg.append(bmm_t(2.0 * xg[-1]) - xg[-2])
        pad = kd_pad - cheby_k * din
        if pad:
            # zero-pad the Chebyshev feature axis to a sublane multiple so the
            # (E, KDpad) -> E*KDpad merge below is tile-aligned.
            xg.append(jnp.zeros((bb, pad, n), jnp.float32))
        xgt = jnp.concatenate(xg, axis=1)                        # (BB, KDpad, N) k-major/i-minor

        st = st_ref[...].astype(jnp.float32)                     # (BB, E, N)
        e_dim = st.shape[1]

        # z^T[b, (e, m), n] = station_emb[b, n, e] * xg[b, n, m]  (e-major, m-minor),
        # built as one lane-dense broadcast outer product.
        zt = (st[:, :, None, :] * xgt[:, None, :, :]).reshape(bb, e_dim * kd_pad, n)
        zt = zt.astype(matmul_dtype)

        # out^T = W^T @ z^T  (batched; node axis lane-dense on the output).
        w = wt_ref[...].astype(matmul_dtype)
        w = jnp.broadcast_to(w[None], (bb,) + w.shape)           # (BB, Dout, E*KDpad)
        out = jax.lax.dot_general(
            w, zt, (((2,), (1,)), ((0,), (0,))),
            preferred_element_type=jnp.float32)                  # (BB, Dout, N)

        # bias^T = b^T @ station^T  (tiny matmul + VPU add; no unaligned lane concat).
        b = bt_ref[...].astype(matmul_dtype)
        b = jnp.broadcast_to(b[None], (bb,) + b.shape)           # (BB, Dout, E)
        out = out + jax.lax.dot_general(
            b, st.astype(matmul_dtype), (((2,), (1,)), ((0,), (0,))),
            preferred_element_type=jnp.float32)

        o_ref[...] = out.astype(o_ref.dtype)

    return kernel


def _vmem_budget_bytes():
    """Generation-aware VMEM budget: 0.8 * physical capacity, safe fallback 48 MiB."""
    cap = None
    try:
        info = pltpu.get_tpu_info()
        cap = getattr(info, "vmem_capacity_bytes", None)
    except Exception:
        cap = None
    if not cap:
        cap = 60 * 1024 * 1024          # unknown generation -> assume small (v7x-like)
    return int(0.8 * cap)               # leave headroom for double buffers / scratch


def _per_elem_vmem_bytes(n, din, e, kd_pad, dout):
    """Rough f32 working-set bytes per batch element inside one grid step."""
    f = 4
    supports = 3 * n * n * f                      # logits / exp / supports live together
    xg = (kd_pad + din) * n * f                   # Chebyshev states
    z = 2 * e * kd_pad * n * f                    # z^T plus one relayout copy
    io = 2 * (din + 2 * e + dout) * n * f         # double-buffered activations / outputs
    return supports + xg + z + io


def _choose_batch_split(b_pad, bb_max):
    """Smallest chunk count G >= 2 (feeds both v7x TCs) with chunks fitting VMEM."""
    for g in range(2, b_pad + 1):
        if b_pad % g == 0 and (b_pad // g) <= bb_max:
            return g, b_pad // g
    return b_pad, 1


def multihead_dygcn(x, all_emb, station_emb, weights_pools, bias_pools, cheby_k,
                    matmul_dtype=jnp.float32, approx_recip=False):
    """weights_pools: list (per head) of (E, K, Din, Dh); bias_pools: list of (E, Dh)."""
    B, N, Din = x.shape
    E = all_emb.shape[-1]
    K = cheby_k
    assert K >= 2

    KD = K * Din
    KD_pad = ((KD + 7) // 8) * 8            # pad Chebyshev feature axis to sublane multiple

    # Weights: flatten (e, k, i) row-major, concat heads on the output axis, zero-pad the
    # (k, i) rows of each e-block to KD_pad, transpose to (Dout, E*KD_pad).
    w_flat = jnp.concatenate(
        [w.reshape(E * KD, -1) for w in weights_pools], axis=1)   # (E*KD, Dout)
    Dout = w_flat.shape[1]
    w3 = w_flat.reshape(E, KD, Dout)
    if KD_pad != KD:
        w3 = jnp.pad(w3, ((0, 0), (0, KD_pad - KD), (0, 0)))
    wT = jnp.transpose(w3.reshape(E * KD_pad, Dout))              # (Dout, E*KD_pad)
    bT = jnp.transpose(jnp.concatenate(bias_pools, axis=1))       # (Dout, E)
    C = E * KD_pad

    # Transposed activations (node axis last -> lane-dense everywhere in the kernel).
    xT = jnp.transpose(x, (0, 2, 1))                              # (B, Din, N)
    sT = jnp.transpose(station_emb, (0, 2, 1))                    # (B, E, N)

    # Pad batch to even so the "parallel" grid axis can always feed both v7x TensorCores
    # (padded rows produce finite garbage that is sliced off below).
    B_pad = B + (B % 2)
    if B_pad != B:
        padb = ((0, B_pad - B), (0, 0), (0, 0))
        xT = jnp.pad(xT, padb)
        sT = jnp.pad(sT, padb)
        emb_p = jnp.pad(all_emb, padb)
    else:
        emb_p = all_emb

    budget = _vmem_budget_bytes()
    fixed = 2 * 4 * (C * Dout + E * Dout)                         # double-buffered weights
    per_elem = _per_elem_vmem_bytes(N, Din, E, KD_pad, Dout)
    bb_max = max(1, (budget - fixed) // per_elem)
    G, BB = _choose_batch_split(B_pad, bb_max)

    kernel = make_dygcn_kernel(K, KD_pad, matmul_dtype, approx_recip)
    out = pl.pallas_call(
        kernel,
        out_shape=jax.ShapeDtypeStruct((B_pad, Dout, N), x.dtype),
        grid_spec=pltpu.PrefetchScalarGridSpec(
            num_scalar_prefetch=0,
            grid=(G,),
            in_specs=[
                pl.BlockSpec((BB, Din, N), lambda g: (g, 0, 0)),
                pl.BlockSpec((BB, N, E), lambda g: (g, 0, 0)),
                pl.BlockSpec((BB, E, N), lambda g: (g, 0, 0)),
                pl.BlockSpec((Dout, C), lambda g: (0, 0)),
                pl.BlockSpec((Dout, E), lambda g: (0, 0)),
            ],
            out_specs=pl.BlockSpec((BB, Dout, N), lambda g: (g, 0, 0)),
        ),
        compiler_params=pltpu.CompilerParams(
            dimension_semantics=("parallel",),
            vmem_limit_bytes=budget),
    )(xT, emb_p, sT, wT, bT)

    # Transpose the small (B, Dout, N) result back to (B, N, Dout) outside the kernel.
    return jnp.transpose(out[:B], (0, 2, 1))


def reference(x, all_emb, station_emb, weights_pools, bias_pools, cheby_k):
    """Pure-JAX mirror of the PyTorch MutilHeadDyGCN forward (aggregate_type='sum')."""
    B, N, _ = all_emb.shape
    supports = jax.nn.softmax(
        jnp.maximum(jnp.einsum('bne,bme->bnm', all_emb, all_emb), 0.0), axis=-1)
    t0 = jnp.broadcast_to(jnp.eye(N, dtype=x.dtype), (B, N, N))
    ts = [t0, supports]
    for _ in range(2, cheby_k):
        ts.append(jnp.matmul(2.0 * supports, ts[-1]) - ts[-2])
    sc = jnp.stack(ts, axis=1)                                    # (B, K, N, N)
    outs = []
    for wp, bp in zip(weights_pools, bias_pools):
        weights = jnp.einsum('bni,ikop->bnkop', station_emb, wp)
        bias = jnp.matmul(station_emb, bp)
        x_g = jnp.einsum('bkij,bjd->bkid', sc, x)
        x_gc = jnp.einsum('bkni,bnkio->bnko', x_g, weights)
        outs.append(x_gc.sum(axis=2) + bias)
    return jnp.concatenate(outs, axis=-1)


if __name__ == "__main__":
    # Small, module-consistent shapes.
    B, N = 2, 16                 # batch, num nodes
    DIM_IN = 4
    DIM_OUT = 8                  # total output dim (split across heads)
    CHEBY_K = 3
    EMBED_DIM = 8
    NUM_HEADS = 2
    DH = DIM_OUT // NUM_HEADS

    key = jax.random.PRNGKey(0)
    keys = jax.random.split(key, 3 + 2 * NUM_HEADS)
    x = jax.random.normal(keys[0], (B, N, DIM_IN), dtype=jnp.float32)
    all_emb = jax.random.normal(keys[1], (B, N, EMBED_DIM), dtype=jnp.float32)
    station_emb = jax.random.normal(keys[2], (B, N, EMBED_DIM), dtype=jnp.float32)

    # Deterministic per-head parameters (weights_pool / bias_pool of each DyGCN head).
    weights_pools = [
        0.1 * jax.random.normal(keys[3 + 2 * h],
                                (EMBED_DIM, CHEBY_K, DIM_IN, DH),
                                dtype=jnp.float32)
        for h in range(NUM_HEADS)
    ]
    bias_pools = [
        0.1 * jax.random.normal(keys[4 + 2 * h], (EMBED_DIM, DH),
                                dtype=jnp.float32)
        for h in range(NUM_HEADS)
    ]

    out = multihead_dygcn(x, all_emb, station_emb,
                          weights_pools, bias_pools, CHEBY_K)
    out = jax.block_until_ready(out)

    ref = reference(x, all_emb, station_emb,
                    weights_pools, bias_pools, CHEBY_K)
    np.testing.assert_allclose(np.asarray(out), np.asarray(ref),
                               rtol=1e-4, atol=1e-4)
    print("KERNEL_OK")
</pallas_src>

<mosaic_0001>
module attributes {stable_mosaic.version = 11 : i64} {
  func.func @kernel(%arg0: i32, %arg1: memref<1x4x16xf32, #tpu.memory_space<vmem>>, %arg2: memref<1x16x8xf32, #tpu.memory_space<vmem>>, %arg3: memref<1x8x16xf32, #tpu.memory_space<vmem>>, %arg4: memref<8x128xf32, #tpu.memory_space<vmem>>, %arg5: memref<8x8xf32, #tpu.memory_space<vmem>>, %arg6: memref<1x8x16xf32, #tpu.memory_space<vmem>>) attributes {dimension_semantics = [#tpu.dimension_semantics<parallel>], iteration_bounds = array<i64: 2>, scalar_prefetch = 0 : i64, scratch_operands = 0 : i64, tpu.core_type = #tpu.core_type<tc>, window_params = [{transform_indices = @transform_0, window_bounds = array<i64: 1, 4, 16>}, {transform_indices = @transform_1, window_bounds = array<i64: 1, 16, 8>}, {transform_indices = @transform_2, window_bounds = array<i64: 1, 8, 16>}, {pipeline_mode = #tpu.pipeline_mode<synchronous>, transform_indices = @transform_3, window_bounds = array<i64: 8, 128>}, {pipeline_mode = #tpu.pipeline_mode<synchronous>, transform_indices = @transform_4, window_bounds = array<i64: 8, 8>}, {transform_indices = @transform_5, window_bounds = array<i64: 1, 8, 16>}]} {
    %c0 = arith.constant 0 : index
    %c0_0 = arith.constant 0 : index
    %c0_1 = arith.constant 0 : index
    %0 = vector.load %arg2[%c0, %c0_0, %c0_1] : memref<1x16x8xf32, #tpu.memory_space<vmem>>, vector<1x16x8xf32>
    %cst = arith.constant dense<0.000000e+00> : vector<1x16x16xf32>
    %1 = tpu.matmul %0, %0, %cst {dimension_numbers = #tpu.dot_dimension_numbers<[2], [2], [1], [1], [0, 0, 0, 1, 1, 1], [0], [0]>} : vector<1x16x8xf32>, vector<1x16x8xf32>, vector<1x16x16xf32> -> vector<1x16x16xf32>
    %cst_2 = arith.constant 0.000000e+00 : f32
    %2 = vector.broadcast %cst_2 : f32 to vector<1x16x16xf32>
    %3 = arith.maximumf %1, %2 : vector<1x16x16xf32>
    %cst_3 = arith.constant dense<0xFF800000> : vector<1x16xf32>
    %4 = vector.multi_reduction <maximumf>, %3, %cst_3 [2] : vector<1x16x16xf32> to vector<1x16xf32>
    %5 = vector.shape_cast %4 : vector<1x16xf32> to vector<1x16x1xf32>
    %6 = vector.broadcast %5 : vector<1x16x1xf32> to vector<1x16x16xf32>
    %7 = arith.subf %3, %6 : vector<1x16x16xf32>
    %8 = math.exp %7 : vector<1x16x16xf32>
    %cst_4 = arith.constant dense<0.000000e+00> : vector<1x16xf32>
    %9 = vector.multi_reduction <add>, %8, %cst_4 [2] : vector<1x16x16xf32> to vector<1x16xf32>
    %10 = vector.shape_cast %9 : vector<1x16xf32> to vector<1x16x1xf32>
    %11 = tpu.reciprocal %10 : vector<1x16x1xf32> -> vector<1x16x1xf32>
    %12 = vector.broadcast %11 : vector<1x16x1xf32> to vector<1x16x16xf32>
    %13 = arith.mulf %8, %12 : vector<1x16x16xf32>
    %c0_5 = arith.constant 0 : index
    %c0_6 = arith.constant 0 : index
    %c0_7 = arith.constant 0 : index
    %14 = vector.load %arg1[%c0_5, %c0_6, %c0_7] : memref<1x4x16xf32, #tpu.memory_space<vmem>>, vector<1x4x16xf32>
    %cst_8 = arith.constant dense<0.000000e+00> : vector<1x4x16xf32>
    %15 = tpu.matmul %14, %13, %cst_8 {dimension_numbers = #tpu.dot_dimension_numbers<[2], [2], [1], [1], [0, 0, 0, 1, 1, 1], [0], [0]>} : vector<1x4x16xf32>, vector<1x16x16xf32>, vector<1x4x16xf32> -> vector<1x4x16xf32>
    %cst_9 = arith.constant 2.000000e+00 : f32
    %16 = vector.broadcast %cst_9 : f32 to vector<1x4x16xf32>
    %17 = arith.mulf %16, %15 : vector<1x4x16xf32>
    %cst_10 = arith.constant dense<0.000000e+00> : vector<1x4x16xf32>
    %18 = tpu.matmul %17, %13, %cst_10 {dimension_numbers = #tpu.dot_dimension_numbers<[2], [2], [1], [1], [0, 0, 0, 1, 1, 1], [0], [0]>} : vector<1x4x16xf32>, vector<1x16x16xf32>, vector<1x4x16xf32> -> vector<1x4x16xf32>
    %19 = arith.subf %18, %14 : vector<1x4x16xf32>
    %cst_11 = arith.constant 0.000000e+00 : f32
    %20 = vector.broadcast %cst_11 : f32 to vector<1x4x16xf32>
    %21 = tpu.concatenate %14, %15, %19, %20 in 1 : vector<1x4x16xf32>, vector<1x4x16xf32>, vector<1x4x16xf32>, vector<1x4x16xf32> -> vector<1x16x16xf32>
    %c0_12 = arith.constant 0 : index
    %c0_13 = arith.constant 0 : index
    %c0_14 = arith.constant 0 : index
    %22 = vector.load %arg3[%c0_12, %c0_13, %c0_14] : memref<1x8x16xf32, #tpu.memory_space<vmem>>, vector<1x8x16xf32>
    %23 = vector.shape_cast %22 : vector<1x8x16xf32> to vector<1x8x1x16xf32>
    %24 = vector.shape_cast %21 : vector<1x16x16xf32> to vector<1x1x16x16xf32>
    %25 = vector.broadcast %23 : vector<1x8x1x16xf32> to vector<1x8x16x16xf32>
    %26 = vector.broadcast %24 : vector<1x1x16x16xf32> to vector<1x8x16x16xf32>
    %27 = arith.mulf %25, %26 : vector<1x8x16x16xf32>
    %28 = vector.shape_cast %27 : vector<1x8x16x16xf32> to vector<1x128x16xf32>
    %c0_15 = arith.constant 0 : index
    %c0_16 = arith.constant 0 : index
    %29 = vector.load %arg4[%c0_15, %c0_16] : memref<8x128xf32, #tpu.memory_space<vmem>>, vector<8x128xf32>
    %30 = vector.shape_cast %29 : vector<8x128xf32> to vector<1x8x128xf32>
    %cst_17 = arith.constant dense<0.000000e+00> : vector<1x8x16xf32>
    %31 = tpu.matmul %30, %28, %cst_17 {dimension_numbers = #tpu.dot_dimension_numbers<[2], [1], [1], [2], [0, 0, 0, 1, 1, 2], [0], [0]>} : vector<1x8x128xf32>, vector<1x128x16xf32>, vector<1x8x16xf32> -> vector<1x8x16xf32>
    %c0_18 = arith.constant 0 : index
    %c0_19 = arith.constant 0 : index
    %32 = vector.load %arg5[%c0_18, %c0_19] : memref<8x8xf32, #tpu.memory_space<vmem>>, vector<8x8xf32>
    %33 = vector.shape_cast %32 : vector<8x8xf32> to vector<1x8x8xf32>
    %cst_20 = arith.constant dense<0.000000e+00> : vector<1x8x16xf32>
    %34 = tpu.matmul %33, %22, %cst_20 {dimension_numbers = #tpu.dot_dimension_numbers<[2], [1], [1], [2], [0, 0, 0, 1, 1, 2], [0], [0]>} : vector<1x8x8xf32>, vector<1x8x16xf32>, vector<1x8x16xf32> -> vector<1x8x16xf32>
    %35 = arith.addf %31, %34 : vector<1x8x16xf32>
    %c0_21 = arith.constant 0 : index
    %c0_22 = arith.constant 0 : index
    %c0_23 = arith.constant 0 : index
    %36 = vector.load %arg6[%c0_21, %c0_22, %c0_23] : memref<1x8x16xf32, #tpu.memory_space<vmem>>, vector<1x8x16xf32>
    tpu.vector_store %arg6[%c0_21, %c0_22, %c0_23], %35 {strides = array<i32>} : memref<1x8x16xf32, #tpu.memory_space<vmem>>, vector<1x8x16xf32>,
    return
  }
  func.func @transform_0(%arg0: i32) -> (i32, i32, i32) {
    %c0_i32 = arith.constant 0 : i32
    %c0_i32_0 = arith.constant 0 : i32
    %c0_i32_1 = arith.constant 0 : i32
    return %arg0, %c0_i32, %c0_i32_0 : i32, i32, i32
  }
  func.func @transform_1(%arg0: i32) -> (i32, i32, i32) {
    %c0_i32 = arith.constant 0 : i32
    %c0_i32_0 = arith.constant 0 : i32
    %c0_i32_1 = arith.constant 0 : i32
    return %arg0, %c0_i32, %c0_i32_0 : i32, i32, i32
  }
  func.func @transform_2(%arg0: i32) -> (i32, i32, i32) {
    %c0_i32 = arith.constant 0 : i32
    %c0_i32_0 = arith.constant 0 : i32
    %c0_i32_1 = arith.constant 0 : i32
    return %arg0, %c0_i32, %c0_i32_0 : i32, i32, i32
  }
  func.func @transform_3(%arg0: i32) -> (i32, i32) {
    %c0_i32 = arith.constant 0 : i32
    %c0_i32_0 = arith.constant 0 : i32
    %c0_i32_1 = arith.constant 0 : i32
    return %c0_i32, %c0_i32_0 : i32, i32
  }
  func.func @transform_4(%arg0: i32) -> (i32, i32) {
    %c0_i32 = arith.constant 0 : i32
    %c0_i32_0 = arith.constant 0 : i32
    %c0_i32_1 = arith.constant 0 : i32
    return %c0_i32, %c0_i32_0 : i32, i32
  }
  func.func @transform_5(%arg0: i32) -> (i32, i32, i32) {
    %c0_i32 = arith.constant 0 : i32
    %c0_i32_0 = arith.constant 0 : i32
    %c0_i32_1 = arith.constant 0 : i32
    return %arg0, %c0_i32, %c0_i32_0 : i32, i32, i32
  }
}

</mosaic_0001>

<bundles_post_ra>
// kernel: tpu_custom_call.1
= control target key start
LH: loop header
LB: loop body
LE: loop exit
PB: predicated region body
PF: predicated region fallthrough
CT: control target
= control target key end

     0   :  { %10 = vsyncpa [#allocation3], 0  ;;  %s1329_s0 = inlined_call_operand.vmem [shape: f32[2,4,16], index: 0, kind: input, shape index: {}]   ;;  %s1330_s1 = inlined_call_operand.vmem [shape: f32[2,16,8], index: 1, kind: input, shape index: {}]   ;;  %s1331_s2 = inlined_call_operand.vmem [shape: f32[2,8,16], index: 2, kind: input, shape index: {}]   ;;  %s1332_s3 = inlined_call_operand.vmem [shape: f32[8,128], index: 3, kind: input, shape index: {}]   ;;  %s1333_s4 = inlined_call_operand.vmem [shape: f32[8,8], index: 4, kind: input, shape index: {}]   ;;  %s1334_s5 = inlined_call_operand.hbm [shape: f32[2,8,16], index: 5, kind: output, shape index: {}]  }
   0x1   :  { %12 = vsyncpa [#allocation3 + $0x1], 0  ;;  %s1182_s18 = smov 0   ;;  %s1184_s19 = smov 0  }
   0x2   :  { %s1186_s20 = smov 0   ;;  %s1188_s21 = smov 0  }
   0x3 LB: > { %s1203_s22 = sadd.s32 4294967295, %s1145_s21   ;;  %s877_s23 = sadd.s32 4294967294, %s1145_s21   ;;  %s1145_s21 = sphi %s1188_s21, %s1340_s21   ;;  %s1141_s20 = sphi %s1186_s20, %s1339_s20   ;;  %s1137_s19 = sphi %s1184_s19, %s1338_s19   ;;  %s1133_s18 = sphi %s1182_s18, %s1337_s18  }
   0x4   : > { %s1207_s24 = sadd.s32 1, %s1145_s21   ;;  %s145_s25 = sadd.s32 1, %s1141_s20 }
   0x5   : > { %s142_s26 = ssub.s32 %s1145_s21, %s1207_s24  ;;  %p155_p0 = scmp.ne.s32.totalorder %s1141_s20, %s1137_s19 }
   0x6   : > { %p143_p1 = scmp.eq.s32.totalorder %s142_s26, 0  ;;  %p156_p2 = scmp.eq.s32.totalorder %s1203_s22, 1 }
   0x7   : > { %p161_p3 = scmp.ne.s32.totalorder %s1137_s19, %s1133_s18  ;;  %p162_p4 = scmp.eq.s32.totalorder %s877_s23, 1 }
   0x8   : > { %s1218_s27 = scalar_select %p143_p1, %s1141_s20, %s145_s25  }
   0x9   : > { %p1220_p5 = por %p156_p2, %p155_p0  ;;  %p1224_p6 = por %p162_p4, %p161_p3 }
   0xa   : > { %p880_p7 = scmp.ge.s32.totalorder %s1145_s21, 1  ;;  %p208_p8 = scmp.lt.s32.totalorder %s1145_s21, 3 }
   0xc   : > { %p209_p9 = pnand %p880_p7, %p208_p8 }
   0xd   : > { %p244_p10 = scmp.lt.s32.totalorder (!%p209_p9), %s1203_s22, 1  ;;  %vm259_vm0 = vcmask (!%p209_p9), 64512   ;;  %vm343_vm2 = vcmask (!%p209_p9), 130048   ;;  %v1147_v19 = vmov (!%p209_p9), 0.0|0.0   ;;  %vm1148_vm3 = vmmov (!%p209_p9), 0   ;;  %v635_v33 = vld [vmem:[%s1333_s4] sm:$0xff] (!%p209_p9) }
   0xe   : > { %212 = sbr.rel (%p209_p9) target bundleno = 1270 (0x4f6), region = 40  ;;  %vm993_vm1 = vmpackc.low (!%p209_p9), %vm259_vm0, %vm259_vm0  ;;  %1006 = vmatprep.subr.bf16.mxu1 (!%p209_p9), %v1147_v19  ;;  %v1149_v20 = vmov (!%p209_p9), 0.0   ;;  %v1150_v34 = vmov (!%p209_p9), 1966171168   ;;  %v533_v36 = vlaneseq (!%p209_p9)  ;;  %vm524_vm5 = vcmask (!%p209_p9), 1043456   ;;  %s898_s8 = sshll.u32 (!%p209_p9), %s1203_s22, 7 }
   0xf   : > { %989 = vmatprep.mubr.msk.f32.mxu1 (!%p209_p9), %vm1148_vm3, %v1149_v20  ;;  %vm1000_vm4 = vmpackc.low (!%p209_p9), %vm343_vm2, %vm343_vm2  ;;  %v531_v35 = vunpack.c.l.s4 (!%p209_p9), %v1150_v34 }
  0x10   : > { %v534_v38 = vshrl.u32 (!%p209_p9), %v533_v36, 7 }
  0x11   : > { %v532_v37 = vunpack.c.0.s8 (!%p209_p9), %v531_v35 }
  0x12   : > { %v580_v49 = vsub.s32 (!%p209_p9), 0, %v534_v38 }
  0x13   : > { %v535_v39 = vsub.s32 (!%p209_p9), %v532_v37, %v534_v38 }
  0x15   : > { %s1232_s30 = scalar_select %p244_p10, %s1203_s22, 1 }
  0x16   : > { %s1151_s22 = smov [#allocation2]  }
  0x17   : > { %s901_s6 = sshll.u32 %s1232_s30, 4  ;;  %s882_s10 = sshll.u32 %s1232_s30, 2 }
  0x18   : > { %s252_s9 = scalar_lea.vmem %s1330_s1, %s901_s6  ;;  %s247_s13 = scalar_lea.vmem %s1329_s0, %s882_s10 }
  0x19   : > { %v257_v0 = vld [vmem:[%s252_s9] sm:$0xff]  ;;  %v258_v1 = vld [vmem:[%s252_s9 + $0x8] sm:$0xff]  ;;  %s885_s14 = sshll.u32 %s1232_s30, 3  ;;  %s241_s6 = sand.u32 1, %s1137_s19  }
  0x1a   : > { %v992_v2 = vpack.c.bf16 %v258_v1, %v257_v0  ;;  %935 = vmatprep.mubr.msk.f32.mxu0 %vm259_vm0, %v257_v0  ;;  %v366_v28 = vld [vmem:[%s247_s13] sm:$0xf]  ;;  %s256_s17 = scalar_lea.vmem %s1331_s2, %s885_s14  ;;  %s881_s7 = sshll.u32 %s241_s6, 3 }
  0x1b   : > { %v527_v32 = vld [vmem:[%s256_s17] sm:$0xff]  ;;  %s243_s9 = scalar_lea.vmem [#allocation2], %s881_s7  ;;  %s1286_s13 = scalar_lea.hbm %s1334_s5, %s898_s8 }
  0x1c   : > { %994 = vmatprep.subr.msk.bf16.mxu0 %vm993_vm1, %v992_v2  ;;  %v529_v40 = vcombine.high %v527_v32, %v527_v32  ;;  %v536_v41 = vrot.slane %v527_v32, %v535_v39  ;;  %s794_s10 = sshll.u32 %s243_s9, 4  ;;  %s781_s14 = scalar_lea.sflag [#allocation3], %s241_s6  ;;  %s1288_s10 = int_to_ptr.vmem [resolvable:$true] %s794_s10 }
  0x1d   : > { %997 = vmatpush3.bf16.xpose.msk.msra.mxu0 %vm993_vm1, %v992_v2  ;;  %s1083_s15 = scalar_lea.vmem %s1288_s10, 128  ;;  %s1087_s16 = sshll.u32 %s1151_s22, 4  ;;  %s1088_s16 = int_to_ptr.vmem [resolvable:$false] %s1087_s16 }
  0x1e   : > { %998 = vmatprep.subr.bf16.mxu0 %v1147_v19  ;;  %v543_v42 = vrot.slane %v529_v40, %v535_v39  ;;  %v544_v43 = vcombine.high %v536_v41, %v536_v41  ;;  %v552_v45 = vrot.slane %v536_v41, %v535_v39  ;;  %p1084_p11 = scmp.ne.s32.totalorder %s1288_s10, %s1083_s15  ;;  %s1089_s17 = scalar_lea.vmem %s1088_s16, 256 }
  0x1f   : > { %p1090_p0 = scmp.lt.s32.totalorder %s1288_s10, %s1088_s16  ;;  %p1091_p1 = scmp.lt.s32.totalorder %s1089_s17, %s1083_s15 }
  0x20   : > { %v545_v44 = vcombine.high %v543_v42, %v543_v42  ;;  %v566_v46 = vrot.slane %v544_v43, %v535_v39  ;;  %v559_v47 = vrot.slane %v543_v42, %v535_v39  ;;  %v574_v51 = vcombine.high %v552_v45, %v552_v45  ;;  %p1085_p12 = pnand %p1084_p11, %p1220_p5 }
  0x21   : > { %v581_v55 = vrot.slane %v552_v45, %v580_v49  ;;  %p1092_p2 = por %p1091_p1, %p1090_p0 }
  0x22   : > { %v573_v48 = vrot.slane %v545_v44, %v535_v39  ;;  %v576_v52 = vcombine.high %v566_v46, %v566_v46  ;;  %v575_v53 = vcombine.high %v559_v47, %v559_v47  ;;  %v585_v56 = vrot.slane %v566_v46, %v580_v49  ;;  %p1086_p13 = pneg %p1085_p12 }
  0x23   : > { %v589_v58 = vrot.slane %v574_v51, %v580_v49  ;;  %v597_v60 = vrot.slane %v559_v47, %v580_v49 }
  0x24   : > { %936 = vmatmul.mubr.msk.f32.vlgmr.msra.gmra.mrb[0].mxu0 %vm259_vm0, %v258_v1  ;;  %v577_v54 = vcombine.high %v573_v48, %v573_v48  ;;  %v593_v59 = vrot.slane %v576_v52, %v580_v49  ;;  %v601_v61 = vrot.slane %v573_v48, %v580_v49  ;;  %v605_v62 = vrot.slane %v575_v53, %v580_v49  ;;  %p1093_p3 = pnand %p1092_p2, %p1086_p13 }
  0x25   : > { %942 = vmatprep.mubr.msk.f32.mxu0 %vm1148_vm3, %v1149_v20 }
  0x26   : > { %v609_v63 = vrot.slane %v577_v54, %v580_v49 }
  0xf7   : > { %v937_v3 = vpop.f32.mrb[0].mxu0 }
  0xf8   : > { %v332_v4 = vpop.f32.mrb[1].mxu0  ;;  %v342_v6 = vmax.f32 %v937_v3, 0.0 }
  0xf9   : > { %v341_v5 = vmax.f32 %v332_v4, 0.0 }
  0xfa   : > { %v347_v8 = vsel %vm343_vm2, %v342_v6, -inf }
  0xfb   : > { %v344_v7 = vsel %vm343_vm2, %v341_v5, -inf }
  0xfc   : > { %345 = vmax.xlane.f32.xlu0 %v344_v7 }
 0x100   : > { %348 = vmax.xlane.f32.xlu0 %v347_v8 }
 0x189   : > { %v346_v9 = vpop.xlane.xlu0 %345 }
 0x18a   : > { %v350_v10 = vsub.f32 %v341_v5, %v346_v9 }
 0x18c   : > { %v352_v11 = vmul.f32 1.442695, %v350_v10 }
 0x18d   : > { %v349_v12 = vpop.xlane.xlu0 %348 }
 0x18e   : > { %1075 = vpow2.f32 %v352_v11  ;;  %v351_v13 = vsub.f32 %v342_v6, %v349_v12 }
 0x190   : > { %v354_v14 = vmul.f32 1.442695, %v351_v13 }
 0x192   : > { %1077 = vpow2.f32 %v354_v14 }
 0x198   : > { %v1076_v15 = vpop.eup %1075 }
 0x199   : > { %v356_v16 = vsel %vm343_vm2, %v1076_v15, 0.0 }
 0x19a   : > { %357 = vadd.xlane.f32.xlu1 %v356_v16 }
 0x19c   : > { %v1078_v17 = vpop.eup %1077 }
 0x19d   : > { %v359_v18 = vsel %vm343_vm2, %v1078_v17, 0.0 }
 0x19e   : > { %360 = vadd.xlane.f32.xlu1 %v359_v18 }
 0x227   : > { %v358_v21 = vpop.xlane.xlu1 %357 }
 0x228   : > { %1079 = vrcp.f32 %v358_v21 }
 0x22b   : > { %v361_v22 = vpop.xlane.xlu1 %360 }
 0x22c   : > { %1081 = vrcp.f32 %v361_v22 }
 0x232   : > { %v1080_v23 = vpop.eup %1079 }
 0x233   : > { %v364_v25 = vmul.f32 %v1080_v23, %v1076_v15 }
 0x236   : > { %v1082_v24 = vpop.eup %1081 }
 0x237   : > { %v365_v26 = vmul.f32 %v1082_v24, %v1078_v17 }
 0x239   : > { %v999_v27 = vpack.c.bf16 %v365_v26, %v364_v25 }
 0x23b   : > { %1001 = vmatpush3.bf16.xpose.msk.msra.mxu0 %vm1000_vm4, %v999_v27 }
 0x23c   : > { %1002 = vmatprep.subr.bf16.mxu0 %v1147_v19 }
 0x242   : > { %943 = vmatmul.mubr.msk.f32.vlgmr.msra.gmra.mrb[2].mxu0 %vm343_vm2, %v366_v28 }
 0x243   : > { %1005 = vmatpush3.bf16.xpose.msk.msra.mxu0 %vm1000_vm4, %v999_v27  ;;  %949 = vmatprep.mubr.msk.f32.mxu0 %vm1148_vm3, %v1149_v20 }
 0x244   : > { %952 = vmatprep.subr.mxu0 %v1149_v20 }
 0x315   : > { %v442_v29 = vpop.f32.mrb[2].mxu0 }
 0x316   : > { %v446_v30 = vmul.f32 2.0, %v442_v29  ;;  %v944_v31 = vpop.f32.mrb[3].mxu0  ;;  %v522_v50 = vrot.slane %v442_v29, 4  ;;  %v634_v29 = vld [vmem:[%s1332_s3] sm:$0xff] }
 0x318   : > { %950 = vmatmul.mubr.msk.f32.vlgmr.msra.gmra.mrb[4].mxu0 %vm343_vm2, %v446_v30  ;;  %v525_v57 = vsel %vm524_vm5, %v366_v28, %v522_v50 }
 0x319   : > { %953 = vmatpush3.msra.mxu0 %v527_v32  ;;  %954 = vmatprep.mubr.msk.f32.mxu0 %vm1148_vm3, %v1149_v20  ;;  %v618_v3 = vmul.f32 %v581_v55, %v525_v57  ;;  %v620_v4 = vmul.f32 %v585_v56, %v525_v57  ;;  %v622_v5 = vmul.f32 %v589_v58, %v525_v57 }
 0x31a   : > { %v624_v6 = vmul.f32 %v593_v59, %v525_v57  ;;  %v626_v7 = vmul.f32 %v597_v60, %v525_v57  ;;  %v628_v9 = vmul.f32 %v601_v61, %v525_v57  ;;  %v630_v10 = vmul.f32 %v605_v62, %v525_v57 }
 0x31b   : > { %v632_v11 = vmul.f32 %v609_v63, %v525_v57 }
 0x31c   : > { %955 = vmatmul.mubr.msk.f32.vlgmr.msra.gmra.mrb[6].mxu0 %vm259_vm0, %v635_v33 }
 0x3eb   : > { %v516_v0 = vpop.f32.mrb[4].mxu0 }
 0x3ec   : > { %v520_v1 = vsub.f32 %v516_v0, %v366_v28  ;;  %v951_v2 = vpop.f32.mrb[5].mxu0 }
 0x3ee   : > { %v526_v8 = vsel %vm524_vm5, %v520_v1, 0.0 }
 0x3ef   : > { %v619_v12 = vmul.f32 %v581_v55, %v526_v8  ;;  %v621_v13 = vmul.f32 %v585_v56, %v526_v8  ;;  %v623_v14 = vmul.f32 %v589_v58, %v526_v8  ;;  %v625_v15 = vmul.f32 %v593_v59, %v526_v8  ;;  %v705_v30 = vpop.f32.mrb[6].mxu0 }
 0x3f0   : > { %v627_v16 = vmul.f32 %v597_v60, %v526_v8  ;;  %v629_v17 = vmul.f32 %v601_v61, %v526_v8  ;;  %v631_v18 = vmul.f32 %v605_v62, %v526_v8  ;;  %v633_v20 = vmul.f32 %v609_v63, %v526_v8  ;;  %v956_v31 = vpop.f32.mrb[7].mxu0 }
 0x3f1   : > { %v1007_v21 = vpack.c.bf16 %v619_v12, %v618_v3  ;;  %v1010_v22 = vpack.c.bf16 %v621_v13, %v620_v4  ;;  %v1013_v23 = vpack.c.bf16 %v623_v14, %v622_v5  ;;  %v1016_v24 = vpack.c.bf16 %v625_v15, %v624_v6 }
 0x3f2   : > { %v1019_v25 = vpack.c.bf16 %v627_v16, %v626_v7  ;;  %v1022_v26 = vpack.c.bf16 %v629_v17, %v628_v9  ;;  %v1025_v27 = vpack.c.bf16 %v631_v18, %v630_v10  ;;  %v1028_v28 = vpack.c.bf16 %v633_v20, %v632_v11 }
 0x3f3   : > { %1008 = vmatpush3.bf16.msra.mxu1 %v1007_v21 }
 0x3f4   : > { %1009 = vmatprep.subr.bf16.mxu1 %v1147_v19 }
 0x3f7   : > { %1011 = vmatpush3.bf16.msra.mxu1 %v1010_v22 }
 0x3f8   : > { %1012 = vmatprep.subr.bf16.mxu1 %v1147_v19 }
 0x3fb   : > { %1014 = vmatpush3.bf16.msra.mxu1 %v1013_v23 }
 0x3fc   : > { %1015 = vmatprep.subr.bf16.mxu1 %v1147_v19 }
 0x3ff   : > { %1017 = vmatpush3.bf16.msra.mxu1 %v1016_v24 }
 0x400   : > { %1018 = vmatprep.subr.bf16.mxu1 %v1147_v19 }
 0x403   : > { %1020 = vmatpush3.bf16.msra.mxu1 %v1019_v25 }
 0x404   : > { %1021 = vmatprep.subr.bf16.mxu1 %v1147_v19 }
 0x407   : > { %1023 = vmatpush3.bf16.msra.mxu1 %v1022_v26 }
 0x408   : > { %1024 = vmatprep.subr.bf16.mxu1 %v1147_v19 }
 0x40b   : > { %1026 = vmatpush3.bf16.msra.mxu1 %v1025_v27 }
 0x40c   : > { %1027 = vmatprep.subr.bf16.mxu1 %v1147_v19 }
 0x40f   : > { %1029 = vmatpush3.bf16.msra.mxu1 %v1028_v28 }
 0x412   : > { %990 = vmatmul.mubr.f32.vlgmr.msra.gmra.mrb[0].mxu1 %v634_v29 }
 0x4e5   : > { %v775_v32 = vpop.f32.mrb[0].mxu1 }
 0x4e6   : > { %v776_v33 = vadd.f32 %v775_v32, %v705_v30  ;;  %v991_v34 = vpop.f32.mrb[1].mxu1 }
 0x4e8   : > { %779 = vst.msk [vmem:[%s243_s9] sm:$0xff] %vm343_vm2, %v776_v33 }
 0x4e9   : > { %1096 = shalt.err (!%p1093_p3)
}
 0x4ea   : > { %s1097_s23 = scalar_lea.hbm %s1286_s13, 128  ;;  %s1101_s30 = scalar_lea.hbm %s1334_s5, 256 }
 0x4eb   : > { %p1098_p4 = scmp.ne.s32.totalorder %s1286_s13, %s1097_s23  ;;  %p1102_p9 = scmp.lt.u32.totalorder %s1286_s13, %s1334_s5 }
 0x4ec   : > { %p1103_p10 = scmp.lt.u32.totalorder %s1101_s30, %s1097_s23  ;;  %p1105_p12 = scmp.lt.u32.totalorder %s1097_s23, %s1286_s13 }
 0x4ed   : > { %p1099_p7 = pnand %p1098_p4, %p1220_p5 }
 0x4ee   : > { %p1104_p11 = por %p1103_p10, %p1102_p9 }
 0x4ef   : > { %p1100_p8 = pneg %p1099_p7 }
 0x4f0   : > { %p1106_p13 = por %p1105_p12, %p1104_p11 }
 0x4f2   : > { %p1107_p0 = pnand %p1106_p13, %p1100_p8 }
 0x4f4   : > { %1110 = shalt.err (!%p1107_p0)
}
 0x4f5   : > { %1031 = dma.vmem_to_hbm [thread:$0]  (%p1220_p5), %s1288_s10, 128, %s1286_s13, %s781_s14  }
 0x4f6 PF: > { %p1037_p1 = scmp.ge.s32.totalorder %s1145_s21, 2  ;;  %s806_s8 = sand.u32 1, %s1133_s18  }
 0x4f7   : > { %s807_s9 = scalar_lea.sflag [#allocation3], %s806_s8 }
 0x4f8   : > { %p1034_p2 = pnand %p1037_p1, %p1224_p6 }
 0x4fa   : > { %1128 = dma.done.wait (!%p1034_p2), %s807_s9, 128  }
 0x4fb   : > { %1130 = vsyncadd (!%p1034_p2), %s807_s9, 4294967168  ;;  %p15_p3 = scmp.ge.s32.totalorder %s1207_s24, 4   ;;  %s1337_s18 = smov %s1137_s19 }
 0x4fc   : > { %s1338_s19 = smov %s1141_s20  ;;  %s1339_s20 = smov %s1218_s27 }
 0x4fd   : > { %s1340_s21 = smov %s1207_s24  ;;  %17 = sbr.rel (!%p15_p3) target bundleno = 3 (0x3), region = 81 }
 0x504   :  { %812 = vsyncpa [#allocation3], 1 }
 0x505   :  { %814 = vsyncpa [#allocation3 + $0x1], 1 }

</bundles_post_ra>
